<compile_context>
chip_gen: v7x
topology: tpu7x:2x2x1
jax: 0.10.0
libtpu: 0.0.40
codegen_flags: <defaults>
</compile_context>

<pallas_src>
import jax
import jax.numpy as jnp
from jax.experimental import pallas as pl
from jax.experimental.pallas import tpu as pltpu


def _round_up(x, m):
    return (x + m - 1) // m * m


# ----------------------------------------------------------------------------- kernel
def deepfm_kernel(x_ref, fo_w_ref, pool_ref,
                  w0_ref, b0_ref, w1_ref, b1_ref, w2_ref, b2_ref,
                  wout_ref, bias_ref, out_ref):
    x = x_ref[...]                                                    # (TB, F) f32

    # ---- FM first order: [ones over emb1 cols | 0 | lin_w over dense cols] ----
    fo_logit = jnp.sum(x * fo_w_ref[...], axis=-1, keepdims=True)     # (TB, 1)  VPU + XLU

    # ---- FM second order via pooling matmul ----
    sq = x * x
    sum_emb = jnp.dot(x, pool_ref[...], preferred_element_type=jnp.float32)    # (TB, E)
    sum_sq = jnp.dot(sq, pool_ref[...], preferred_element_type=jnp.float32)    # (TB, E)
    cross = 0.5 * jnp.sum(sum_emb * sum_emb - sum_sq, axis=-1, keepdims=True)  # (TB, 1)

    # ---- DNN: bf16 MXU inputs, f32 accumulation; dropout(p=0) == identity ----
    h = jnp.dot(x.astype(jnp.bfloat16), w0_ref[...],
                preferred_element_type=jnp.float32) + b0_ref[...]
    h = jnp.maximum(h, 0.0)
    h = jnp.dot(h.astype(jnp.bfloat16), w1_ref[...],
                preferred_element_type=jnp.float32) + b1_ref[...]
    h = jnp.maximum(h, 0.0)
    h = jnp.dot(h.astype(jnp.bfloat16), w2_ref[...],
                preferred_element_type=jnp.float32) + b2_ref[...]
    h = jnp.maximum(h, 0.0)

    # final 1-unit projection as VPU multiply + row reduce (avoid N=1 MXU matmul)
    dnn_out = jnp.sum(h * wout_ref[...], axis=-1, keepdims=True)      # (TB, 1)

    out_ref[...] = fo_logit + cross + dnn_out + bias_ref[0, 0]


# ----------------------------------------------------------------------------- glue
def prepare_inputs(X, params, num_sparse, num_dense, emb_size):
    """Embedding lookups + fused activation row [emb1 | emb2_flat | dense]."""
    sp_idx = X[:, :num_sparse].astype(jnp.int32)                                   # (B, S)
    emb1 = jnp.stack([params["emb1"][i][sp_idx[:, i], 0]
                      for i in range(num_sparse)], axis=-1)                        # (B, S)
    emb2_flat = jnp.concatenate([params["emb2"][i][sp_idx[:, i]]
                                 for i in range(num_sparse)], axis=-1)             # (B, S*E)
    dense = X[:, num_sparse:num_sparse + num_dense]                                # (B, D)
    return jnp.concatenate([emb1, emb2_flat, dense], axis=-1)                      # (B, F)


def prepare_weights(params, num_sparse, num_dense, emb_size):
    """Derived, kernel-friendly weight layouts (built once, outside the kernel)."""
    S, D, E = num_sparse, num_dense, emb_size
    h0 = params["w0"].shape[1]

    # FM first-order row: ones for emb1 columns, zeros for emb2 columns, lin_w for dense.
    fo_w = jnp.concatenate([jnp.ones((S,), jnp.float32),
                            jnp.zeros((S * E,), jnp.float32),
                            params["lin_w"][:, 0]])[None, :]                        # (1, F)

    # Pooling matrix: (F, E) 0/1, sums the S embedding vectors per embedding dim.
    eye = jnp.eye(E, dtype=jnp.float32)
    pool = jnp.concatenate([jnp.zeros((S, E), jnp.float32),
                            jnp.tile(eye, (S, 1)),
                            jnp.zeros((D, E), jnp.float32)], axis=0)                # (F, E)

    # Zero-row-extended first DNN layer so it consumes x_all directly (no in-kernel slice).
    w0_ext = jnp.concatenate([jnp.zeros((S, h0), jnp.float32), params["w0"]], axis=0)

    return dict(
        fo_w=fo_w, pool=pool,
        w0=w0_ext.astype(jnp.bfloat16), b0=params["b0"],
        w1=params["w1"].astype(jnp.bfloat16), b1=params["b1"],
        w2=params["w2"].astype(jnp.bfloat16), b2=params["b2"],
        wout=params["wout"].reshape(1, -1),            # (1, H2) f32 for the VPU reduce
        bias=params["bias"],                           # (1, 1)  -> SMEM
    )


def deepfm_forward(X, params, num_sparse, num_dense, emb_size, block_b=1024):
    B = X.shape[0]
    S, D, E = num_sparse, num_dense, emb_size
    F = S + S * E + D
    H0 = params["w0"].shape[1]
    H1 = params["w1"].shape[1]
    H2 = params["w2"].shape[1]

    x_all = prepare_inputs(X, params, S, D, E)
    w = prepare_weights(params, S, D, E)

    # Batch tile: multiple of 128 (MXU M), bounded by block_b; pad B up to a multiple of TB.
    TB = min(block_b, _round_up(B, 128))
    Bp = _round_up(B, TB)
    if Bp != B:
        x_all = jnp.pad(x_all, ((0, Bp - B), (0, 0)))
    grid = (Bp // TB,)

    def const(i):
        return (0, 0)

    in_specs = [
        pl.BlockSpec((TB, F), lambda i: (i, 0)),     # x_all       (batch-tiled, pipelined)
        pl.BlockSpec((1, F), const),                 # fo_w        (VMEM-resident)
        pl.BlockSpec((F, E), const),                 # pool
        pl.BlockSpec((F, H0), const),                # w0 (bf16)
        pl.BlockSpec((1, H0), const),                # b0
        pl.BlockSpec((H0, H1), const),               # w1 (bf16)
        pl.BlockSpec((1, H1), const),                # b1
        pl.BlockSpec((H1, H2), const),               # w2 (bf16)
        pl.BlockSpec((1, H2), const),                # b2
        pl.BlockSpec((1, H2), const),                # wout row
        pl.BlockSpec(memory_space=pltpu.MemorySpace.SMEM),   # bias scalar
    ]

    out = pl.pallas_call(
        deepfm_kernel,
        out_shape=jax.ShapeDtypeStruct((Bp, 1), jnp.float32),
        grid=grid,
        in_specs=in_specs,
        out_specs=pl.BlockSpec((TB, 1), lambda i: (i, 0)),
        compiler_params=pltpu.CompilerParams(
            dimension_semantics=("parallel",),
            vmem_limit_bytes=32 * 1024 * 1024),
    )(x_all, w["fo_w"], w["pool"], w["w0"], w["b0"], w["w1"], w["b1"],
      w["w2"], w["b2"], w["wout"], w["bias"])

    return out[:B]


# ----------------------------------------------------------------------------- reference
def deepfm_ref(X, params, num_sparse, num_dense, emb_size):
    """Pure-JAX f32 reference mirroring the PyTorch forward."""
    B = X.shape[0]
    sp_idx = X[:, :num_sparse].astype(jnp.int32)
    emb1 = jnp.stack([params["emb1"][i][sp_idx[:, i], 0]
                      for i in range(num_sparse)], axis=-1)                        # (B, S)
    emb2 = jnp.stack([params["emb2"][i][sp_idx[:, i]]
                      for i in range(num_sparse)], axis=1)                         # (B, S, E)
    dense = X[:, num_sparse:num_sparse + num_dense]

    logit = jnp.sum(emb1, axis=-1, keepdims=True) + dense @ params["lin_w"]
    s = jnp.sum(emb2, axis=1)
    cross = 0.5 * jnp.sum(s * s - jnp.sum(emb2 * emb2, axis=1), axis=-1, keepdims=True)
    logit = logit + cross

    h = jnp.concatenate([emb2.reshape(B, -1), dense], axis=-1)
    h = jnp.maximum(h @ params["w0"] + params["b0"], 0.0)
    h = jnp.maximum(h @ params["w1"] + params["b1"], 0.0)
    h = jnp.maximum(h @ params["w2"] + params["b2"], 0.0)
    return logit + h @ params["wout"] + params["bias"]


# ----------------------------------------------------------------------------- demo
if __name__ == "__main__":
    feat_sizes = [10, 7, 13, 5, 20]      # vocab size per sparse feature
    num_sparse = len(feat_sizes)         # S = 5
    num_dense = 3                        # D = 3
    emb_size = 4                         # E = 4
    hidden = [128, 128, 128]             # MXU-lane-aligned small hidden sizes
    B = 300                              # exercises multi-step grid + batch padding
    dnn_in_dim = num_sparse * emb_size + num_dense

    key = jax.random.PRNGKey(0)
    keys = iter(jax.random.split(key, 32))

    init_std = 1e-4
    params = {
        "emb1": [init_std * jax.random.normal(next(keys), (fs, 1), jnp.float32)
                 for fs in feat_sizes],
        "emb2": [init_std * jax.random.normal(next(keys), (fs, emb_size), jnp.float32)
                 for fs in feat_sizes],
        "lin_w": init_std * jax.random.normal(next(keys), (num_dense, 1), jnp.float32),
        "w0": init_std * jax.random.normal(next(keys), (dnn_in_dim, hidden[0]), jnp.float32),
        "b0": 0.01 * jax.random.normal(next(keys), (1, hidden[0]), jnp.float32),
        "w1": init_std * jax.random.normal(next(keys), (hidden[0], hidden[1]), jnp.float32),
        "b1": 0.01 * jax.random.normal(next(keys), (1, hidden[1]), jnp.float32),
        "w2": init_std * jax.random.normal(next(keys), (hidden[1], hidden[2]), jnp.float32),
        "b2": 0.01 * jax.random.normal(next(keys), (1, hidden[2]), jnp.float32),
        "wout": 0.1 * jax.random.normal(next(keys), (hidden[2], 1), jnp.float32),
        "bias": jnp.zeros((1, 1), jnp.float32),
    }

    # X: sparse index columns (stored as floats, like the DataFrame) then dense columns.
    sparse_cols = jnp.stack(
        [jax.random.randint(next(keys), (B,), 0, fs).astype(jnp.float32)
         for fs in feat_sizes], axis=-1)                              # (B, S)
    dense_cols = jax.random.normal(next(keys), (B, num_dense), jnp.float32)
    X = jnp.concatenate([sparse_cols, dense_cols], axis=-1)           # (B, S+D)

    out = deepfm_forward(X, params, num_sparse, num_dense, emb_size, block_b=128)
    out = jax.block_until_ready(out)

    ref = deepfm_ref(X, params, num_sparse, num_dense, emb_size)
    assert out.shape == (B, 1)
    # bf16 MXU inputs (f32 accumulation) -> loosen tolerance slightly vs. the f32 reference.
    max_err = jnp.max(jnp.abs(out - ref))
    assert jnp.allclose(out, ref, atol=2e-3, rtol=2e-2), (max_err, out[:4], ref[:4])

    print("KERNEL_OK")
</pallas_src>

<mosaic_0001>
module attributes {stable_mosaic.version = 11 : i64} {
  func.func @deepfm_kernel(%arg0: i32, %arg1: memref<128x28xf32, #tpu.memory_space<vmem>>, %arg2: memref<1x28xf32, #tpu.memory_space<vmem>>, %arg3: memref<28x4xf32, #tpu.memory_space<vmem>>, %arg4: memref<28x128xbf16, #tpu.memory_space<vmem>>, %arg5: memref<1x128xf32, #tpu.memory_space<vmem>>, %arg6: memref<128x128xbf16, #tpu.memory_space<vmem>>, %arg7: memref<1x128xf32, #tpu.memory_space<vmem>>, %arg8: memref<128x128xbf16, #tpu.memory_space<vmem>>, %arg9: memref<1x128xf32, #tpu.memory_space<vmem>>, %arg10: memref<1x128xf32, #tpu.memory_space<vmem>>, %arg11: memref<1x1xf32, #tpu.memory_space<smem>>, %arg12: memref<128x1xf32, #tpu.memory_space<vmem>>) attributes {dimension_semantics = [#tpu.dimension_semantics<parallel>], iteration_bounds = array<i64: 3>, scalar_prefetch = 0 : i64, scratch_operands = 0 : i64, tpu.core_type = #tpu.core_type<tc>, window_params = [{transform_indices = @transform_0, window_bounds = array<i64: 128, 28>}, {pipeline_mode = #tpu.pipeline_mode<synchronous>, transform_indices = @transform_1, window_bounds = array<i64: 1, 28>}, {pipeline_mode = #tpu.pipeline_mode<synchronous>, transform_indices = @transform_2, window_bounds = array<i64: 28, 4>}, {pipeline_mode = #tpu.pipeline_mode<synchronous>, transform_indices = @transform_3, window_bounds = array<i64: 28, 128>}, {pipeline_mode = #tpu.pipeline_mode<synchronous>, transform_indices = @transform_4, window_bounds = array<i64: 1, 128>}, {pipeline_mode = #tpu.pipeline_mode<synchronous>, transform_indices = @transform_5, window_bounds = array<i64: 128, 128>}, {pipeline_mode = #tpu.pipeline_mode<synchronous>, transform_indices = @transform_6, window_bounds = array<i64: 1, 128>}, {pipeline_mode = #tpu.pipeline_mode<synchronous>, transform_indices = @transform_7, window_bounds = array<i64: 128, 128>}, {pipeline_mode = #tpu.pipeline_mode<synchronous>, transform_indices = @transform_8, window_bounds = array<i64: 1, 128>}, {pipeline_mode = #tpu.pipeline_mode<synchronous>, transform_indices = @transform_9, window_bounds = array<i64: 1, 128>}, {transform_indices = @transform_10, window_bounds = array<i64: 1, 1>}, {transform_indices = @transform_11, window_bounds = array<i64: 128, 1>}]} {
    %c0 = arith.constant 0 : index
    %c0_0 = arith.constant 0 : index
    %0 = vector.load %arg1[%c0, %c0_0] : memref<128x28xf32, #tpu.memory_space<vmem>>, vector<128x28xf32>
    %c0_1 = arith.constant 0 : index
    %c0_2 = arith.constant 0 : index
    %1 = vector.load %arg2[%c0_1, %c0_2] : memref<1x28xf32, #tpu.memory_space<vmem>>, vector<1x28xf32>
    %2 = vector.broadcast %1 : vector<1x28xf32> to vector<128x28xf32>
    %3 = arith.mulf %0, %2 : vector<128x28xf32>
    %cst = arith.constant dense<0.000000e+00> : vector<128xf32>
    %4 = vector.multi_reduction <add>, %3, %cst [1] : vector<128x28xf32> to vector<128xf32>
    %5 = vector.shape_cast %4 : vector<128xf32> to vector<128x1xf32>
    %6 = arith.mulf %0, %0 : vector<128x28xf32>
    %c0_3 = arith.constant 0 : index
    %c0_4 = arith.constant 0 : index
    %7 = vector.load %arg3[%c0_3, %c0_4] : memref<28x4xf32, #tpu.memory_space<vmem>>, vector<28x4xf32>
    %cst_5 = arith.constant dense<0.000000e+00> : vector<128x4xf32>
    %8 = tpu.matmul %0, %7, %cst_5 {dimension_numbers = #tpu.dot_dimension_numbers<[1], [0], [0], [1], [0, 0, 1, 1], [], []>} : vector<128x28xf32>, vector<28x4xf32>, vector<128x4xf32> -> vector<128x4xf32>
    %c0_6 = arith.constant 0 : index
    %c0_7 = arith.constant 0 : index
    %9 = vector.load %arg3[%c0_6, %c0_7] : memref<28x4xf32, #tpu.memory_space<vmem>>, vector<28x4xf32>
    %cst_8 = arith.constant dense<0.000000e+00> : vector<128x4xf32>
    %10 = tpu.matmul %6, %9, %cst_8 {dimension_numbers = #tpu.dot_dimension_numbers<[1], [0], [0], [1], [0, 0, 1, 1], [], []>} : vector<128x28xf32>, vector<28x4xf32>, vector<128x4xf32> -> vector<128x4xf32>
    %11 = arith.mulf %8, %8 : vector<128x4xf32>
    %12 = arith.subf %11, %10 : vector<128x4xf32>
    %cst_9 = arith.constant dense<0.000000e+00> : vector<128xf32>
    %13 = vector.multi_reduction <add>, %12, %cst_9 [1] : vector<128x4xf32> to vector<128xf32>
    %14 = vector.shape_cast %13 : vector<128xf32> to vector<128x1xf32>
    %cst_10 = arith.constant 5.000000e-01 : f32
    %15 = vector.broadcast %cst_10 : f32 to vector<128x1xf32>
    %16 = arith.mulf %15, %14 : vector<128x1xf32>
    %17 = arith.truncf %0 : vector<128x28xf32> to vector<128x28xbf16>
    %c0_11 = arith.constant 0 : index
    %c0_12 = arith.constant 0 : index
    %18 = vector.load %arg4[%c0_11, %c0_12] : memref<28x128xbf16, #tpu.memory_space<vmem>>, vector<28x128xbf16>
    %cst_13 = arith.constant dense<0.000000e+00> : vector<128x128xf32>
    %19 = tpu.matmul %17, %18, %cst_13 {dimension_numbers = #tpu.dot_dimension_numbers<[1], [0], [0], [1], [0, 0, 1, 1], [], []>} : vector<128x28xbf16>, vector<28x128xbf16>, vector<128x128xf32> -> vector<128x128xf32>
    %c0_14 = arith.constant 0 : index
    %c0_15 = arith.constant 0 : index
    %20 = vector.load %arg5[%c0_14, %c0_15] : memref<1x128xf32, #tpu.memory_space<vmem>>, vector<1x128xf32>
    %21 = vector.broadcast %20 : vector<1x128xf32> to vector<128x128xf32>
    %22 = arith.addf %19, %21 : vector<128x128xf32>
    %cst_16 = arith.constant 0.000000e+00 : f32
    %23 = vector.broadcast %cst_16 : f32 to vector<128x128xf32>
    %24 = arith.maximumf %22, %23 : vector<128x128xf32>
    %25 = arith.truncf %24 : vector<128x128xf32> to vector<128x128xbf16>
    %c0_17 = arith.constant 0 : index
    %c0_18 = arith.constant 0 : index
    %26 = vector.load %arg6[%c0_17, %c0_18] : memref<128x128xbf16, #tpu.memory_space<vmem>>, vector<128x128xbf16>
    %cst_19 = arith.constant dense<0.000000e+00> : vector<128x128xf32>
    %27 = tpu.matmul %25, %26, %cst_19 {dimension_numbers = #tpu.dot_dimension_numbers<[1], [0], [0], [1], [0, 0, 1, 1], [], []>} : vector<128x128xbf16>, vector<128x128xbf16>, vector<128x128xf32> -> vector<128x128xf32>
    %c0_20 = arith.constant 0 : index
    %c0_21 = arith.constant 0 : index
    %28 = vector.load %arg7[%c0_20, %c0_21] : memref<1x128xf32, #tpu.memory_space<vmem>>, vector<1x128xf32>
    %29 = vector.broadcast %28 : vector<1x128xf32> to vector<128x128xf32>
    %30 = arith.addf %27, %29 : vector<128x128xf32>
    %cst_22 = arith.constant 0.000000e+00 : f32
    %31 = vector.broadcast %cst_22 : f32 to vector<128x128xf32>
    %32 = arith.maximumf %30, %31 : vector<128x128xf32>
    %33 = arith.truncf %32 : vector<128x128xf32> to vector<128x128xbf16>
    %c0_23 = arith.constant 0 : index
    %c0_24 = arith.constant 0 : index
    %34 = vector.load %arg8[%c0_23, %c0_24] : memref<128x128xbf16, #tpu.memory_space<vmem>>, vector<128x128xbf16>
    %cst_25 = arith.constant dense<0.000000e+00> : vector<128x128xf32>
    %35 = tpu.matmul %33, %34, %cst_25 {dimension_numbers = #tpu.dot_dimension_numbers<[1], [0], [0], [1], [0, 0, 1, 1], [], []>} : vector<128x128xbf16>, vector<128x128xbf16>, vector<128x128xf32> -> vector<128x128xf32>
    %c0_26 = arith.constant 0 : index
    %c0_27 = arith.constant 0 : index
    %36 = vector.load %arg9[%c0_26, %c0_27] : memref<1x128xf32, #tpu.memory_space<vmem>>, vector<1x128xf32>
    %37 = vector.broadcast %36 : vector<1x128xf32> to vector<128x128xf32>
    %38 = arith.addf %35, %37 : vector<128x128xf32>
    %cst_28 = arith.constant 0.000000e+00 : f32
    %39 = vector.broadcast %cst_28 : f32 to vector<128x128xf32>
    %40 = arith.maximumf %38, %39 : vector<128x128xf32>
    %c0_29 = arith.constant 0 : index
    %c0_30 = arith.constant 0 : index
    %41 = vector.load %arg10[%c0_29, %c0_30] : memref<1x128xf32, #tpu.memory_space<vmem>>, vector<1x128xf32>
    %42 = vector.broadcast %41 : vector<1x128xf32> to vector<128x128xf32>
    %43 = arith.mulf %40, %42 : vector<128x128xf32>
    %cst_31 = arith.constant dense<0.000000e+00> : vector<128xf32>
    %44 = vector.multi_reduction <add>, %43, %cst_31 [1] : vector<128x128xf32> to vector<128xf32>
    %45 = vector.shape_cast %44 : vector<128xf32> to vector<128x1xf32>
    %46 = arith.addf %5, %16 : vector<128x1xf32>
    %47 = arith.addf %46, %45 : vector<128x1xf32>
    %c0_32 = arith.constant 0 : index
    %c0_33 = arith.constant 0 : index
    %48 = memref.load %arg11[%c0_32, %c0_33] : memref<1x1xf32, #tpu.memory_space<smem>>
    %49 = vector.broadcast %48 : f32 to vector<128x1xf32>
    %50 = arith.addf %47, %49 : vector<128x1xf32>
    %c0_34 = arith.constant 0 : index
    %c0_35 = arith.constant 0 : index
    %51 = vector.load %arg12[%c0_34, %c0_35] : memref<128x1xf32, #tpu.memory_space<vmem>>, vector<128x1xf32>
    tpu.vector_store %arg12[%c0_34, %c0_35], %50 {strides = array<i32>} : memref<128x1xf32, #tpu.memory_space<vmem>>, vector<128x1xf32>,
    return
  }
  func.func @transform_0(%arg0: i32) -> (i32, i32) {
    %c0_i32 = arith.constant 0 : i32
    %c0_i32_0 = arith.constant 0 : i32
    return %arg0, %c0_i32 : i32, i32
  }
  func.func @transform_1(%arg0: i32) -> (i32, i32) {
    %c0_i32 = arith.constant 0 : i32
    %c0_i32_0 = arith.constant 0 : i32
    %c0_i32_1 = arith.constant 0 : i32
    return %c0_i32, %c0_i32_0 : i32, i32
  }
  func.func @transform_2(%arg0: i32) -> (i32, i32) {
    %c0_i32 = arith.constant 0 : i32
    %c0_i32_0 = arith.constant 0 : i32
    %c0_i32_1 = arith.constant 0 : i32
    return %c0_i32, %c0_i32_0 : i32, i32
  }
  func.func @transform_3(%arg0: i32) -> (i32, i32) {
    %c0_i32 = arith.constant 0 : i32
    %c0_i32_0 = arith.constant 0 : i32
    %c0_i32_1 = arith.constant 0 : i32
    return %c0_i32, %c0_i32_0 : i32, i32
  }
  func.func @transform_4(%arg0: i32) -> (i32, i32) {
    %c0_i32 = arith.constant 0 : i32
    %c0_i32_0 = arith.constant 0 : i32
    %c0_i32_1 = arith.constant 0 : i32
    return %c0_i32, %c0_i32_0 : i32, i32
  }
  func.func @transform_5(%arg0: i32) -> (i32, i32) {
    %c0_i32 = arith.constant 0 : i32
    %c0_i32_0 = arith.constant 0 : i32
    %c0_i32_1 = arith.constant 0 : i32
    return %c0_i32, %c0_i32_0 : i32, i32
  }
  func.func @transform_6(%arg0: i32) -> (i32, i32) {
    %c0_i32 = arith.constant 0 : i32
    %c0_i32_0 = arith.constant 0 : i32
    %c0_i32_1 = arith.constant 0 : i32
    return %c0_i32, %c0_i32_0 : i32, i32
  }
  func.func @transform_7(%arg0: i32) -> (i32, i32) {
    %c0_i32 = arith.constant 0 : i32
    %c0_i32_0 = arith.constant 0 : i32
    %c0_i32_1 = arith.constant 0 : i32
    return %c0_i32, %c0_i32_0 : i32, i32
  }
  func.func @transform_8(%arg0: i32) -> (i32, i32) {
    %c0_i32 = arith.constant 0 : i32
    %c0_i32_0 = arith.constant 0 : i32
    %c0_i32_1 = arith.constant 0 : i32
    return %c0_i32, %c0_i32_0 : i32, i32
  }
  func.func @transform_9(%arg0: i32) -> (i32, i32) {
    %c0_i32 = arith.constant 0 : i32
    %c0_i32_0 = arith.constant 0 : i32
    %c0_i32_1 = arith.constant 0 : i32
    return %c0_i32, %c0_i32_0 : i32, i32
  }
  func.func @transform_10(%arg0: i32) -> (i32, i32) {
    %c0_i32 = arith.constant 0 : i32
    %c0_i32_0 = arith.constant 0 : i32
    %c0_i32_1 = arith.constant 0 : i32
    return %c0_i32, %c0_i32_0 : i32, i32
  }
  func.func @transform_11(%arg0: i32) -> (i32, i32) {
    %c0_i32 = arith.constant 0 : i32
    %c0_i32_0 = arith.constant 0 : i32
    return %arg0, %c0_i32 : i32, i32
  }
}

</mosaic_0001>

<bundles_post_ra>
// kernel: tpu_custom_call.1
= control target key start
LH: loop header
LB: loop body
LE: loop exit
PB: predicated region body
PF: predicated region fallthrough
CT: control target
= control target key end

     0   :  { %s2150_s19 = smov 0   ;;  %s2650_s0 = inlined_call_operand.vmem [shape: f32[384,28], index: 0, kind: input, shape index: {}]   ;;  %s2651_s1 = inlined_call_operand.vmem [shape: f32[1,28], index: 1, kind: input, shape index: {}]   ;;  %s2652_s2 = inlined_call_operand.vmem [shape: f32[28,4], index: 2, kind: input, shape index: {}]   ;;  %s2653_s3 = inlined_call_operand.vmem [shape: bf16[28,128], index: 3, kind: input, shape index: {}]   ;;  %s2654_s4 = inlined_call_operand.vmem [shape: f32[1,128], index: 4, kind: input, shape index: {}]   ;;  %s2655_s5 = inlined_call_operand.vmem [shape: bf16[128,128], index: 5, kind: input, shape index: {}]   ;;  %s2656_s6 = inlined_call_operand.vmem [shape: f32[1,128], index: 6, kind: input, shape index: {}]   ;;  %s2657_s7 = inlined_call_operand.vmem [shape: bf16[128,128], index: 7, kind: input, shape index: {}]   ;;  %s2658_s8 = inlined_call_operand.vmem [shape: f32[1,128], index: 8, kind: input, shape index: {}]   ;;  %s2659_s9 = inlined_call_operand.vmem [shape: f32[1,128], index: 9, kind: input, shape index: {}]   ;;  %s2660_s10 = inlined_call_operand.<no memory space> [shape: f32[1,1], index: 10, kind: input, shape index: {}]   ;;  %s2661_s11 = inlined_call_operand.vmem [shape: f32[384,1], index: 11, kind: output, shape index: {}]  }
   0x1   :  { %16 = sst [smem:[#allocation2]] %s2660_s10 }
   0x2 LB: > { %s1720_s20 = sadd.s32 4294967295, %s2084_s19   ;;  %p1724_p0 = scmp.ge.s32.totalorder %s2084_s19, 1  ;;  %s2084_s19 = sphi %s2150_s19, %s22_s19  }
   0x3   : > { %p339_p1 = scmp.lt.s32.totalorder %s2084_s19, 4 }
   0x5   : > { %p340_p2 = pnand %p1724_p0, %p339_p1 }
   0x6   : > { %v496_v0 = vld [vmem:[%s2652_s2] sm:$0xff] (!%p340_p2)  ;;  %v497_v1 = vld [vmem:[%s2652_s2 + $0x8] sm:$0xff] (!%p340_p2)  ;;  %v498_v2 = vld [vmem:[%s2652_s2 + $0x10] sm:$0xff] (!%p340_p2)  ;;  %vm548_vm0 = vcmask (!%p340_p2), 1043456   ;;  %s1725_s26 = sshll.u32 (!%p340_p2), %s1720_s20, 4  ;;  %vm2086_vm1 = vmmov (!%p340_p2), 1  }
   0x7   : > { %343 = sbr.rel (%p340_p2) target bundleno = 875 (0x36b), region = 64  ;;  %v2026_v3 = vpack.c.bf16 (!%p340_p2), %v497_v1, %v496_v0  ;;  %v499_v4 = vld [vmem:[%s2652_s2 + $0x18] sm:$0xf] (!%p340_p2)  ;;  %p380_p3 = scmp.lt.s32.totalorder (!%p340_p2), %s1725_s26, 47  ;;  %vm2170_vm2 = vmpackc.low (!%p340_p2), %vm548_vm0, %vm2086_vm1  ;;  %vm431_vm3 = vcmask (!%p340_p2), 228352   ;;  %v2060_v7 = vld [vmem:[%s2653_s3] sm:$0xff] (!%p340_p2)  }
   0x8   : > { %v2030_v5 = vpack.c.bf16 (!%p340_p2), %v499_v4, %v498_v2  ;;  %v2061_v12 = vld [vmem:[%s2653_s3 + $0x8] sm:$0x3f] (!%p340_p2)   ;;  %vm1041_vm4 = vcmask (!%p340_p2), 1045504   ;;  %v2223_v15 = vld [vmem:[%s2651_s1] ss:$0 sm:$0xff] (!%p340_p2)  ;;  %vm922_vm5 = vcmask (!%p340_p2), 31744  }
   0x9   : > { %2027 = vmatprep.subr.bf16.mxu0 (!%p340_p2), %v2026_v3  ;;  %2046 = vmatprep.subr.bf16.mxu1 (!%p340_p2), %v2026_v3  ;;  %v1043_v20 = vsel (!%p340_p2), %vm1041_vm4, %v2061_v12, 0  ;;  %v2062_v26 = vld [vmem:[%s2655_s5] sm:$0xff] (!%p340_p2)   ;;  %v2063_v47 = vld [vmem:[%s2655_s5 + $0x8] sm:$0xff] (!%p340_p2)   ;;  %s1629_s27 = sld [smem:[#allocation2]] (!%p340_p2)  ;;  %vm1647_vm6 = vcmask (!%p340_p2), 7168  }
   0xa   : > { %2029 = vmatpush3.bf16.msra.mxu0 (!%p340_p2), %v2026_v3  ;;  %2048 = vmatpush3.bf16.msra.mxu1 (!%p340_p2), %v2026_v3 }
   0xb   : > { %2032 = vmatprep.subr.msk.bf16.mxu0 (!%p340_p2), %vm2170_vm2, %v2030_v5  ;;  %2047 = vmatprep.subr.msk.bf16.mxu1 (!%p340_p2), %vm2170_vm2, %v2030_v5 }
   0xe   : > { %s2665_s26 = smov (!%p380_p3, %s1725_s26), 47  ;;  %2035 = vmatpush3.bf16.msk.msra.mxu0 %vm2170_vm2, %v2030_v5  ;;  %2049 = vmatpush3.bf16.msk.msra.mxu1 %vm2170_vm2, %v2030_v5 }
   0xf   : > { %s1726_s29 = sshll.u32 %s2665_s26, 3  ;;  %1942 = vmatprep.subr.bf16.mxu0 %v2060_v7  ;;  %2037 = vmatprep.subr.bf16.mxu1 %v2026_v3 }
  0x10   : > { %s2186_s13 = scalar_lea.vmem %s2650_s0, %s1726_s29  ;;  %s2583_s12 = scalar_lea.vmem %s2661_s11, %s1726_s29 }
  0x11   : > { %v2192_v8 = vld [vmem:[%s2186_s13] sm:$0xff]  ;;  %v2202_v10 = vld [vmem:[%s2186_s13 + $0x8] sm:$0xff]  ;;  %v2215_v13 = vld [vmem:[%s2186_s13 + $0x10] sm:$0xff] }
  0x12   : > { %v2195_v9 = vld [vmem:[%s2186_s13 + $0x40] sm:$0xff]  ;;  %v2205_v11 = vld [vmem:[%s2186_s13 + $0x48] sm:$0xff]  ;;  %1886 = vmatprep.mubr.msk.f32.mxu0 %vm431_vm3, %v2192_v8  ;;  %v2218_v14 = vld [vmem:[%s2186_s13 + $0x50] sm:$0xff]  ;;  %v417_v23 = vmul.f32 %v2223_v15, %v2215_v13  ;;  %v415_v24 = vmul.f32 %v2223_v15, %v2192_v8  ;;  %v416_v31 = vmul.f32 %v2223_v15, %v2202_v10  ;;  %v480_v36 = vmul.f32 %v2192_v8, %v2192_v8 }
  0x13   : > { %1898 = vmatprep.mubr.msk.f32.mxu1 %vm431_vm3, %v2195_v9  ;;  %1887 = vmatmul.mubr.msk.f32.vlgmr.msra.gmra.mrb[0].mxu0 %vm431_vm3, %v2202_v10  ;;  %v395_v16 = vld [vmem:[%s2186_s13 + $0x18] sm:$0xff]  ;;  %v2234_v18 = vld [vmem:[%s2186_s13 + $0x20] sm:$0xff]  ;;  %v397_v21 = vld [vmem:[%s2186_s13 + $0x28] sm:$0xff]  ;;  %v987_v37 = vpack.c.bf16 %v2202_v10, %v2192_v8  ;;  %v481_v40 = vmul.f32 %v2202_v10, %v2202_v10  ;;  %v482_v44 = vmul.f32 %v2215_v13, %v2215_v13 }
  0x14   : > { %1899 = vmatmul.mubr.msk.f32.vlgmr.msra.gmra.mrb[0].mxu1 %vm431_vm3, %v2205_v11  ;;  %v2231_v17 = vld [vmem:[%s2186_s13 + $0x58] sm:$0xff]  ;;  %1943 = vmatpush3.bf16.msra.mxu0 %v2060_v7  ;;  %v2239_v19 = vld [vmem:[%s2186_s13 + $0x60] sm:$0xff]  ;;  %v2245_v22 = vld [vmem:[%s2186_s13 + $0x68] sm:$0xff]  ;;  %v418_v25 = vmul.f32 %v2223_v15, %v395_v16  ;;  %v438_v28 = vsel %vm431_vm3, %v417_v23, 0.0  ;;  %v432_v30 = vsel %vm431_vm3, %v415_v24, 0.0  ;;  %v420_v34 = vmul.f32 %v2223_v15, %v397_v21 }
  0x15   : > { %1889 = vmatprep.mubr.msk.f32.mxu0 %vm431_vm3, %v2215_v13  ;;  %1901 = vmatprep.mubr.msk.f32.mxu1 %vm431_vm3, %v2218_v14  ;;  %v2263_v27 = vld [vmem:[%s2186_s13 + $0x30] sm:$0xff]  ;;  %v399_v32 = vld [vmem:[%s2186_s13 + $0x38] sm:$0xff]  ;;  %v435_v38 = vsel %vm431_vm3, %v416_v31, 0.0  ;;  %v419_v39 = vmul.f32 %v2223_v15, %v2234_v18  ;;  %v988_v41 = vpack.c.bf16 %v395_v16, %v2215_v13  ;;  %v989_v45 = vpack.c.bf16 %v397_v21, %v2234_v18  ;;  %v2067_v23 = vld [vmem:[%s2655_s5 + $0x28] sm:$0xff]  }
  0x16   : > { %2050 = vmatprep.subr.msk.bf16.mxu0 %vm1041_vm4, %v2061_v12  ;;  %2039 = vmatpush3.bf16.msra.mxu1 %v2026_v3  ;;  %v2267_v29 = vld [vmem:[%s2186_s13 + $0x70] sm:$0xff]  ;;  %v441_v33 = vsel %vm431_vm3, %v418_v25, 0.0  ;;  %v2287_v35 = vld [vmem:[%s2186_s13 + $0x78] sm:$0xff]  ;;  %v447_v42 = vsel %vm431_vm3, %v420_v34, 0.0  ;;  %v422_v43 = vmul.f32 %v2223_v15, %v399_v32  ;;  %v483_v48 = vmul.f32 %v395_v16, %v395_v16 }
  0x17   : > { %1890 = vmatmul.mubr.msk.f32.gmra.mrb[2].mxu0 %vm431_vm3, %v395_v16  ;;  %2042 = vmatprep.subr.msk.bf16.mxu1 %vm2170_vm2, %v2030_v5  ;;  %v444_v46 = vsel %vm431_vm3, %v419_v39, 0.0  ;;  %v484_v50 = vmul.f32 %v2234_v18, %v2234_v18  ;;  %v485_v51 = vmul.f32 %v397_v21, %v397_v21  ;;  %v990_v52 = vpack.c.bf16 %v399_v32, %v2263_v27  ;;  %v2065_v12 = vld [vmem:[%s2655_s5 + $0x18] sm:$0xff]  }
  0x18   : > { %1902 = vmatmul.mubr.msk.f32.gmra.mrb[2].mxu1 %vm431_vm3, %v2231_v17  ;;  %1892 = vmatprep.mubr.msk.f32.mxu0 %vm431_vm3, %v2234_v18  ;;  %v453_v49 = vsel %vm431_vm3, %v422_v43, 0.0  ;;  %v486_v53 = vmul.f32 %v2263_v27, %v2263_v27  ;;  %v991_v54 = vpack.c.bf16 %v2205_v11, %v2195_v9  ;;  %v487_v55 = vmul.f32 %v399_v32, %v399_v32  ;;  %v2066_v18 = vld [vmem:[%s2655_s5 + $0x20] sm:$0xff]  }
  0x19   : > { %1904 = vmatprep.mubr.msk.f32.mxu1 %vm431_vm3, %v2239_v19  ;;  %1945 = vmatpush3.bf16.msra.mxu0 %v1043_v20  ;;  %v488_v56 = vmul.f32 %v2195_v9, %v2195_v9  ;;  %v992_v57 = vpack.c.bf16 %v2231_v17, %v2218_v14  ;;  %v489_v58 = vmul.f32 %v2205_v11, %v2205_v11  ;;  %v2429_v43 = vld [vmem:[%s2654_s4] ss:$0 sm:$0xff] }
  0x1a   : > { %2045 = vmatpush3.bf16.msk.msra.mxu1 %vm2170_vm2, %v2030_v5  ;;  %439 = vadd.xlane.f32.xlu1 %v438_v28  ;;  %v993_v59 = vpack.c.bf16 %v2245_v22, %v2239_v19  ;;  %v490_v60 = vmul.f32 %v2218_v14, %v2218_v14  ;;  %v491_v61 = vmul.f32 %v2231_v17, %v2231_v17  ;;  %v2064_v5 = vld [vmem:[%s2655_s5 + $0x10] sm:$0xff]  }
  0x1b   : > { %1893 = vmatmul.mubr.msk.f32.gmra.mrb[4].mxu0 %vm431_vm3, %v397_v21  ;;  %433 = vadd.xlane.f32.xlu0 %v432_v30  ;;  %v492_v62 = vmul.f32 %v2239_v19, %v2239_v19  ;;  %v994_v63 = vpack.c.bf16 %v2287_v35, %v2267_v29  ;;  %v493_v0 = vmul.f32 %v2245_v22, %v2245_v22 }
  0x1c   : > { %1905 = vmatmul.mubr.msk.f32.gmra.mrb[4].mxu1 %vm431_vm3, %v2245_v22  ;;  %1895 = vmatprep.mubr.msk.f32.mxu0 %vm431_vm3, %v2263_v27  ;;  %v494_v1 = vmul.f32 %v2267_v29, %v2267_v29  ;;  %v495_v2 = vmul.f32 %v2287_v35, %v2287_v35  ;;  %v421_v3 = vmul.f32 %v2223_v15, %v2263_v27  ;;  %v2069_v27 = vld [vmem:[%s2655_s5 + $0x38] sm:$0xff]  }
  0x1d   : > { %1907 = vmatprep.mubr.msk.f32.mxu1 %vm431_vm3, %v2267_v29  ;;  %1962 = vmatprep.subr.bf16.mxu1 %v2062_v26  ;;  %v424_v6 = vmul.f32 %v2223_v15, %v2205_v11  ;;  %v423_v7 = vmul.f32 %v2223_v15, %v2195_v9  ;;  %v426_v13 = vmul.f32 %v2223_v15, %v2231_v17 }
  0x1e   : > { %442 = vadd.xlane.f32.xlu1 %v441_v33  ;;  %v450_v4 = vsel %vm431_vm3, %v421_v3, 0.0  ;;  %v425_v11 = vmul.f32 %v2223_v15, %v2218_v14  ;;  %v428_v20 = vmul.f32 %v2223_v15, %v2245_v22  ;;  %v427_v17 = vmul.f32 %v2223_v15, %v2239_v19 }
  0x1f   : > { %1896 = vmatmul.mubr.msk.f32.gmra.mrb[6].mxu0 %vm431_vm3, %v399_v32  ;;  %436 = vadd.xlane.f32.xlu0 %v435_v38  ;;  %v459_v8 = vsel %vm431_vm3, %v424_v6, 0.0  ;;  %v456_v10 = vsel %vm431_vm3, %v423_v7, 0.0  ;;  %v465_v9 = vsel %vm431_vm3, %v426_v13, 0.0  ;;  %v430_v24 = vmul.f32 %v2223_v15, %v2287_v35 }
  0x20   : > { %1908 = vmatmul.mubr.msk.f32.gmra.mrb[6].mxu1 %vm431_vm3, %v2287_v35  ;;  %1946 = vmatprep.mubr.msk.bf16.mxu0 %vm431_vm3, %v987_v37  ;;  %v462_v16 = vsel %vm431_vm3, %v425_v11, 0.0  ;;  %v471_v14 = vsel %vm431_vm3, %v428_v20, 0.0  ;;  %v468_v21 = vsel %vm431_vm3, %v427_v17, 0.0  ;;  %v429_v22 = vmul.f32 %v2223_v15, %v2267_v29 }
  0x21   : > { %1918 = vmatprep.mubr.msk.f32.mxu1 %vm431_vm3, %v480_v36  ;;  %v477_v19 = vsel %vm431_vm3, %v430_v24, 0.0 }
  0x22   : > { %448 = vadd.xlane.f32.xlu1 %v447_v42  ;;  %v474_v25 = vsel %vm431_vm3, %v429_v22, 0.0 }
  0x23   : > { %1947 = vmatmul.mubr.msk.bf16.vlgmr.msra.gmra.mrb[8].mxu0 %vm431_vm3, %v988_v41  ;;  %445 = vadd.xlane.f32.xlu0 %v444_v46 }
  0x24   : > { %1919 = vmatmul.mubr.msk.f32.vlgmr.msra.gmra.mrb[8].mxu1 %vm431_vm3, %v481_v40  ;;  %1950 = vmatprep.mubr.msk.bf16.mxu0 %vm431_vm3, %v989_v45 }
  0x25   : > { %1921 = vmatprep.mubr.msk.f32.mxu1 %vm431_vm3, %v482_v44  ;;  %1963 = vmatpush3.bf16.msra.mxu1 %v2062_v26  ;;  %v2068_v26 = vld [vmem:[%s2655_s5 + $0x30] sm:$0xff]  }
  0x26   : > { %1964 = vmatprep.subr.bf16.mxu1 %v2063_v47  ;;  %454 = vadd.xlane.f32.xlu1 %v453_v49 }
  0x27   : > { %451 = vadd.xlane.f32.xlu0 %v450_v4 }
  0x28   : > { %1922 = vmatmul.mubr.msk.f32.gmra.mrb[10].mxu1 %vm431_vm3, %v483_v48 }
  0x29   : > { %1924 = vmatprep.mubr.msk.f32.mxu1 %vm431_vm3, %v484_v50  ;;  %1965 = vmatpush3.bf16.msra.mxu1 %v2063_v47 }
  0x2a   : > { %1966 = vmatprep.subr.bf16.mxu1 %v2064_v5  ;;  %460 = vadd.xlane.f32.xlu1 %v459_v8 }
  0x2b   : > { %1951 = vmatmul.mubr.msk.bf16.gmra.mrb[12].mxu0 %vm431_vm3, %v990_v52  ;;  %457 = vadd.xlane.f32.xlu0 %v456_v10 }
  0x2c   : > { %1925 = vmatmul.mubr.msk.f32.gmra.mrb[12].mxu1 %vm431_vm3, %v485_v51  ;;  %1954 = vmatprep.mubr.msk.bf16.mxu0 %vm431_vm3, %v991_v54 }
  0x2d   : > { %1927 = vmatprep.mubr.msk.f32.mxu1 %vm431_vm3, %v486_v53  ;;  %1967 = vmatpush3.bf16.msra.mxu1 %v2064_v5 }
  0x2e   : > { %1968 = vmatprep.subr.bf16.mxu1 %v2065_v12  ;;  %466 = vadd.xlane.f32.xlu1 %v465_v9 }
  0x2f   : > { %463 = vadd.xlane.f32.xlu0 %v462_v16 }
  0x30   : > { %1928 = vmatmul.mubr.msk.f32.gmra.mrb[14].mxu1 %vm431_vm3, %v487_v55 }
  0x31   : > { %1930 = vmatprep.mubr.msk.f32.mxu1 %vm431_vm3, %v488_v56  ;;  %1969 = vmatpush3.bf16.msra.mxu1 %v2065_v12 }
  0x32   : > { %1970 = vmatprep.subr.bf16.mxu1 %v2066_v18  ;;  %472 = vadd.xlane.f32.xlu1 %v471_v14 }
  0x33   : > { %1955 = vmatmul.mubr.msk.bf16.gmra.mrb[16].mxu0 %vm431_vm3, %v992_v57  ;;  %469 = vadd.xlane.f32.xlu0 %v468_v21 }
  0x34   : > { %1931 = vmatmul.mubr.msk.f32.gmra.mrb[16].mxu1 %vm431_vm3, %v489_v58  ;;  %1958 = vmatprep.mubr.msk.bf16.mxu0 %vm431_vm3, %v993_v59 }
  0x35   : > { %1933 = vmatprep.mubr.msk.f32.mxu1 %vm431_vm3, %v490_v60  ;;  %1971 = vmatpush3.bf16.msra.mxu1 %v2066_v18 }
  0x36   : > { %1972 = vmatprep.subr.bf16.mxu1 %v2067_v23  ;;  %478 = vadd.xlane.f32.xlu1 %v477_v19 }
  0x37   : > { %475 = vadd.xlane.f32.xlu0 %v474_v25 }
  0x38   : > { %1934 = vmatmul.mubr.msk.f32.gmra.mrb[18].mxu1 %vm431_vm3, %v491_v61 }
  0x39   : > { %1936 = vmatprep.mubr.msk.f32.mxu1 %vm431_vm3, %v492_v62  ;;  %1973 = vmatpush3.bf16.msra.mxu1 %v2067_v23 }
  0x3a   : > { %1974 = vmatprep.subr.bf16.mxu1 %v2068_v26 }
  0x3b   : > { %1959 = vmatmul.mubr.msk.bf16.gmra.mrb[20].mxu0 %vm431_vm3, %v994_v63 }
  0x3c   : > { %1937 = vmatmul.mubr.msk.f32.gmra.mrb[20].mxu1 %vm431_vm3, %v493_v0 }
  0x3d   : > { %1939 = vmatprep.mubr.msk.f32.mxu1 %vm431_vm3, %v494_v1  ;;  %1975 = vmatpush3.bf16.msra.mxu1 %v2068_v26 }
  0x3e   : > { %1976 = vmatprep.subr.bf16.mxu1 %v2069_v27 }
  0x40   : > { %1940 = vmatmul.mubr.msk.f32.gmra.mrb[22].mxu1 %vm431_vm3, %v495_v2 }
  0x41   : > { %1977 = vmatpush3.bf16.msra.mxu1 %v2069_v27 }
  0xe6   : > { %v1888_v15 = vpop.f32.mrb[0].mxu0 }
  0xe7   : > { %v2410_v28 = vpop.f32.mrb[0].mxu1  ;;  %v618_v29 = vpop.f32.mrb[1].mxu0  ;;  %v891_v44 = vmul.f32 %v1888_v15, %v1888_v15 }
  0xe8   : > { %v2412_v30 = vpop.f32.mrb[1].mxu1  ;;  %v890_v45 = vmul.f32 %v618_v29, %v618_v29 }
  0xea   : > { %v1891_v31 = vpop.f32.mrb[2].mxu0 }
  0xeb   : > { %v2414_v32 = vpop.f32.mrb[2].mxu1  ;;  %v628_v33 = vpop.f32.mrb[3].mxu0  ;;  %v893_v55 = vmul.f32 %v1891_v31, %v1891_v31 }
  0xec   : > { %v2416_v34 = vpop.f32.mrb[3].mxu1  ;;  %v892_v59 = vmul.f32 %v628_v33, %v628_v33 }
  0xee   : > { %v1894_v35 = vpop.f32.mrb[4].mxu0 }
  0xef   : > { %v2418_v36 = vpop.f32.mrb[4].mxu1  ;;  %v638_v37 = vpop.f32.mrb[5].mxu0  ;;  %v895_v6 = vmul.f32 %v1894_v35, %v1894_v35 }
  0xf0   : > { %v2420_v38 = vpop.f32.mrb[5].mxu1  ;;  %v894_v10 = vmul.f32 %v638_v37, %v638_v37 }
  0xf2   : > { %v1897_v39 = vpop.f32.mrb[6].mxu0 }
  0xf3   : > { %v2422_v40 = vpop.f32.mrb[6].mxu1  ;;  %v648_v41 = vpop.f32.mrb[7].mxu0  ;;  %v897_v24 = vmul.f32 %v1897_v39, %v1897_v39 }
  0xf4   : > { %v2424_v42 = vpop.f32.mrb[7].mxu1  ;;  %v896_v26 = vmul.f32 %v648_v41, %v648_v41 }
  0xf6   : > { %v1948_v47 = vpop.f32.mrb[8].mxu0 }
  0xf7   : > { %v1920_v46 = vpop.f32.mrb[8].mxu1  ;;  %v1088_v49 = vadd.f32 %v1948_v47, %v2429_v43  ;;  %v1079_v51 = vpop.f32.mrb[9].mxu0 }
  0xf8   : > { %v907_v48 = vsub.f32 %v891_v44, %v1920_v46  ;;  %v811_v50 = vpop.f32.mrb[9].mxu1  ;;  %v1080_v53 = vadd.f32 %v2429_v43, %v1079_v51  ;;  %v1949_v54 = vpop.f32.mrb[10].mxu0 }
  0xf9   : > { %v906_v52 = vsub.f32 %v890_v45, %v811_v50  ;;  %v1091_v56 = vadd.f32 %v1949_v54, %v2429_v43  ;;  %v1082_v57 = vpop.f32.mrb[11].mxu0  ;;  %v1144_v63 = vmax.f32 %v1088_v49, 0.0 }
  0xfa   : > { %v926_v58 = vsel %vm922_vm5, %v907_v48, 0.0  ;;  %v1083_v60 = vadd.f32 %v2429_v43, %v1082_v57  ;;  %v1142_v3 = vmax.f32 %v1080_v53, 0.0 }
  0xfb   : > { %927 = vadd.xlane.f32.xlu1 %v926_v58  ;;  %v1923_v61 = vpop.f32.mrb[10].mxu1  ;;  %v923_v62 = vsel %vm922_vm5, %v906_v52, 0.0  ;;  %v1145_v0 = vmax.f32 %v1091_v56, 0.0 }
  0xfc   : > { %v909_v1 = vsub.f32 %v893_v55, %v1923_v61  ;;  %v821_v2 = vpop.f32.mrb[11].mxu1  ;;  %924 = vadd.xlane.f32.xlu0 %v923_v62  ;;  %v1143_v4 = vmax.f32 %v1083_v60, 0.0 }
  0xfd   : > { %v908_v5 = vsub.f32 %v892_v59, %v821_v2  ;;  %v1159_v7 = vpack.c.bf16 %v1145_v0, %v1144_v63 }
  0xfe   : > { %v932_v8 = vsel %vm922_vm5, %v909_v1, 0.0  ;;  %v1158_v12 = vpack.c.bf16 %v1143_v4, %v1142_v3  ;;  %v1952_v13 = vpop.f32.mrb[12].mxu0 }
  0xff   : > { %933 = vadd.xlane.f32.xlu1 %v932_v8  ;;  %v1926_v11 = vpop.f32.mrb[12].mxu1  ;;  %v929_v9 = vsel %vm922_vm5, %v908_v5, 0.0  ;;  %v1104_v16 = vadd.f32 %v1952_v13, %v2429_v43  ;;  %v1095_v17 = vpop.f32.mrb[13].mxu0  ;;  %v898_v8 = vmul.f32 %v2412_v30, %v2412_v30  ;;  %v901_v13 = vmul.f32 %v2414_v32, %v2414_v32  ;;  %v2071_v32 = vld [vmem:[%s2657_s7 + $0x8] sm:$0xff]  }
 0x100   : > { %v911_v18 = vsub.f32 %v895_v6, %v1926_v11  ;;  %v831_v20 = vpop.f32.mrb[13].mxu1  ;;  %930 = vadd.xlane.f32.xlu0 %v929_v9  ;;  %v1096_v21 = vadd.f32 %v2429_v43, %v1095_v17  ;;  %v1953_v23 = vpop.f32.mrb[14].mxu0  ;;  %1978 = vmatprep.mubr.bf16.mxu1 %v1158_v12  ;;  %v899_v6 = vmul.f32 %v2410_v28, %v2410_v28  ;;  %v2070_v28 = vld [vmem:[%s2657_s7] sm:$0xff]  }
 0x101   : > { %v910_v14 = vsub.f32 %v894_v10, %v831_v20  ;;  %v1107_v22 = vadd.f32 %v1953_v23, %v2429_v43  ;;  %v1098_v19 = vpop.f32.mrb[15].mxu0  ;;  %1979 = vmatmul.mubr.bf16.vlgmr.msra.gmra.mrb[24].mxu1 %v1159_v7  ;;  %v1148_v31 = vmax.f32 %v1104_v16, 0.0  ;;  %v900_v16 = vmul.f32 %v2416_v34, %v2416_v34  ;;  %1994 = vmatprep.subr.bf16.mxu0 %v2070_v28 }
 0x102   : > { %v938_v25 = vsel %vm922_vm5, %v911_v18, 0.0  ;;  %v1099_v27 = vadd.f32 %v2429_v43, %v1098_v19  ;;  %v1146_v44 = vmax.f32 %v1096_v21, 0.0  ;;  %v902_v21 = vmul.f32 %v2420_v38, %v2420_v38  ;;  %1995 = vmatpush3.bf16.msra.mxu0 %v2070_v28 }
 0x103   : > { %939 = vadd.xlane.f32.xlu1 %v938_v25  ;;  %v1929_v15 = vpop.f32.mrb[14].mxu1  ;;  %v935_v29 = vsel %vm922_vm5, %v910_v14, 0.0  ;;  %v1149_v33 = vmax.f32 %v1107_v22, 0.0  ;;  %v904_v25 = vmul.f32 %v2424_v42, %v2424_v42  ;;  %1996 = vmatprep.subr.bf16.mxu0 %v2071_v32 }
 0x104   : > { %v913_v35 = vsub.f32 %v897_v24, %v1929_v15  ;;  %v841_v37 = vpop.f32.mrb[15].mxu1  ;;  %936 = vadd.xlane.f32.xlu0 %v935_v29  ;;  %v1147_v39 = vmax.f32 %v1099_v27, 0.0  ;;  %v905_v24 = vmul.f32 %v2422_v40, %v2422_v40  ;;  %v2072_v15 = vld [vmem:[%s2657_s7 + $0x10] sm:$0xff]  }
 0x105   : > { %v912_v45 = vsub.f32 %v896_v26, %v841_v37  ;;  %v1161_v46 = vpack.c.bf16 %v1149_v33, %v1148_v31 }
 0x106   : > { %v944_v47 = vsel %vm922_vm5, %v913_v35, 0.0  ;;  %v1160_v48 = vpack.c.bf16 %v1147_v39, %v1146_v44  ;;  %v1956_v49 = vpop.f32.mrb[16].mxu0  ;;  %1997 = vmatpush3.bf16.msra.mxu0 %v2071_v32 }
 0x107   : > { %945 = vadd.xlane.f32.xlu1 %v944_v47  ;;  %v941_v41 = vsel %vm922_vm5, %v912_v45, 0.0  ;;  %v1120_v50 = vadd.f32 %v1956_v49, %v2429_v43  ;;  %v1111_v51 = vpop.f32.mrb[17].mxu0  ;;  %v1932_v20 = vpop.f32.mrb[16].mxu1  ;;  %1998 = vmatprep.subr.bf16.mxu0 %v2072_v15  ;;  %v2073_v45 = vld [vmem:[%s2657_s7 + $0x18] sm:$0xff]  }
 0x108   : > { %942 = vadd.xlane.f32.xlu0 %v941_v41  ;;  %v1112_v52 = vadd.f32 %v2429_v43, %v1111_v51  ;;  %v1957_v53 = vpop.f32.mrb[18].mxu0  ;;  %1982 = vmatprep.mubr.bf16.mxu1 %v1160_v48  ;;  %v915_v17 = vsub.f32 %v899_v6, %v1932_v20  ;;  %v851_v14 = vpop.f32.mrb[17].mxu1  ;;  %v2074_v48 = vld [vmem:[%s2657_s7 + $0x20] sm:$0xff]   ;;  %v2076_v51 = vld [vmem:[%s2657_s7 + $0x30] sm:$0xff]  }
 0x109   : > { %v1123_v54 = vadd.f32 %v1957_v53, %v2429_v43  ;;  %v1114_v55 = vpop.f32.mrb[19].mxu0  ;;  %1983 = vmatmul.mubr.bf16.gmra.mrb[28].mxu1 %v1161_v46  ;;  %v1152_v57 = vmax.f32 %v1120_v50, 0.0  ;;  %v914_v34 = vsub.f32 %v898_v8, %v851_v14  ;;  %v2075_v50 = vld [vmem:[%s2657_s7 + $0x28] sm:$0xff]   ;;  %v1775_v53 = vld [vmem:[%s2656_s6] ss:$0 sm:$0xff] }
 0x10a   : > { %v1115_v56 = vadd.f32 %v2429_v43, %v1114_v55  ;;  %v1150_v59 = vmax.f32 %v1112_v52, 0.0  ;;  %1999 = vmatpush3.bf16.msra.mxu0 %v2072_v15  ;;  %v2077_v52 = vld [vmem:[%s2657_s7 + $0x38] sm:$0xff]  }
 0x10b   : > { %v1153_v58 = vmax.f32 %v1123_v54, 0.0  ;;  %v1935_v23 = vpop.f32.mrb[18].mxu1  ;;  %v947_v38 = vsel %vm922_vm5, %v914_v34, 0.0  ;;  %2000 = vmatprep.subr.bf16.mxu0 %v2073_v45 }
 0x10c   : > { %v1151_v60 = vmax.f32 %v1115_v56, 0.0  ;;  %v917_v22 = vsub.f32 %v901_v13, %v1935_v23  ;;  %v861_v19 = vpop.f32.mrb[19].mxu1  ;;  %948 = vadd.xlane.f32.xlu0 %v947_v38 }
 0x10d   : > { %v1163_v61 = vpack.c.bf16 %v1153_v58, %v1152_v57  ;;  %v916_v26 = vsub.f32 %v900_v16, %v861_v19 }
 0x10e   : > { %v1162_v62 = vpack.c.bf16 %v1151_v60, %v1150_v59  ;;  %v1960_v63 = vpop.f32.mrb[20].mxu0  ;;  %v956_v29 = vsel %vm922_vm5, %v917_v22, 0.0  ;;  %2001 = vmatpush3.bf16.msra.mxu0 %v2073_v45 }
 0x10f   : > { %v1136_v0 = vadd.f32 %v1960_v63, %v2429_v43  ;;  %v1127_v1 = vpop.f32.mrb[21].mxu0  ;;  %v1938_v27 = vpop.f32.mrb[20].mxu1  ;;  %v953_v35 = vsel %vm922_vm5, %v916_v26, 0.0  ;;  %2002 = vmatprep.subr.bf16.mxu0 %v2074_v48 }
 0x110   : > { %v1128_v2 = vadd.f32 %v2429_v43, %v1127_v1  ;;  %v1961_v3 = vpop.f32.mrb[22].mxu0  ;;  %1986 = vmatprep.mubr.bf16.mxu1 %v1162_v62  ;;  %v871_v31 = vpop.f32.mrb[21].mxu1  ;;  %954 = vadd.xlane.f32.xlu0 %v953_v35 }
 0x111   : > { %v1139_v4 = vadd.f32 %v1961_v3, %v2429_v43  ;;  %v1130_v5 = vpop.f32.mrb[23].mxu0  ;;  %1987 = vmatmul.mubr.bf16.gmra.mrb[32].mxu1 %v1163_v61  ;;  %v1156_v10 = vmax.f32 %v1136_v0, 0.0  ;;  %v918_v33 = vsub.f32 %v902_v21, %v871_v31 }
 0x112   : > { %v1131_v7 = vadd.f32 %v2429_v43, %v1130_v5  ;;  %v1154_v11 = vmax.f32 %v1128_v2, 0.0  ;;  %v903_v43 = vmul.f32 %v2418_v36, %v2418_v36  ;;  %v950_v36 = vsel %vm922_vm5, %v915_v17, 0.0  ;;  %2003 = vmatpush3.bf16.msra.mxu0 %v2074_v48 }
 0x113   : > { %v1157_v12 = vmax.f32 %v1139_v4, 0.0  ;;  %951 = vadd.xlane.f32.xlu1 %v950_v36  ;;  %v1941_v42 = vpop.f32.mrb[22].mxu1  ;;  %v959_v47 = vsel %vm922_vm5, %v918_v33, 0.0  ;;  %2004 = vmatprep.subr.bf16.mxu0 %v2075_v50 }
 0x114   : > { %v1155_v9 = vmax.f32 %v1131_v7, 0.0  ;;  %v919_v40 = vsub.f32 %v903_v43, %v1938_v27  ;;  %v921_v37 = vsub.f32 %v905_v24, %v1941_v42  ;;  %v881_v44 = vpop.f32.mrb[23].mxu1  ;;  %960 = vadd.xlane.f32.xlu0 %v959_v47  ;;  %v2509_v47 = vld [vmem:[%s2658_s8] ss:$0 sm:$0xff] }
 0x115   : > { %v1165_v18 = vpack.c.bf16 %v1157_v12, %v1156_v10  ;;  %v920_v39 = vsub.f32 %v904_v25, %v881_v44 }
 0x116   : > { %v1164_v30 = vpack.c.bf16 %v1155_v9, %v1154_v11  ;;  %v962_v46 = vsel %vm922_vm5, %v919_v40, 0.0  ;;  %v968_v49 = vsel %vm922_vm5, %v921_v37, 0.0  ;;  %2005 = vmatpush3.bf16.msra.mxu0 %v2075_v50 }
 0x117   : > { %957 = vadd.xlane.f32.xlu1 %v956_v29  ;;  %v965_v41 = vsel %vm922_vm5, %v920_v39, 0.0  ;;  %2006 = vmatprep.subr.bf16.mxu0 %v2076_v51 }
 0x118   : > { %1990 = vmatprep.mubr.bf16.mxu1 %v1164_v30  ;;  %966 = vadd.xlane.f32.xlu0 %v965_v41 }
 0x119   : > { %1991 = vmatmul.mubr.bf16.gmra.mrb[36].mxu1 %v1165_v18 }
 0x11a   : > { %2007 = vmatpush3.bf16.msra.mxu0 %v2076_v51 }
 0x11b   : > { %963 = vadd.xlane.f32.xlu1 %v962_v46  ;;  %2008 = vmatprep.subr.bf16.mxu0 %v2077_v52 }
 0x11e   : > { %2009 = vmatpush3.bf16.msra.mxu0 %v2077_v52  ;;  %v2516_v52 = vld [vmem:[%s2659_s9] ss:$0 sm:$0xff] }
 0x11f   : > { %969 = vadd.xlane.f32.xlu1 %v968_v49 }
 0x1d4   : > { %v1980_v54 = vpop.f32.mrb[24].mxu1 }
 0x1d5   : > { %v1280_v55 = vadd.f32 %v1980_v54, %v1775_v53  ;;  %v1271_v56 = vpop.f32.mrb[25].mxu1 }
 0x1d6   : > { %v1272_v57 = vadd.f32 %v1775_v53, %v1271_v56  ;;  %v1981_v58 = vpop.f32.mrb[26].mxu1 }
 0x1d7   : > { %v1283_v59 = vadd.f32 %v1981_v58, %v1775_v53  ;;  %v1274_v60 = vpop.f32.mrb[27].mxu1  ;;  %v1336_v62 = vmax.f32 %v1280_v55, 0.0 }
 0x1d8   : > { %v1275_v61 = vadd.f32 %v1775_v53, %v1274_v60  ;;  %v1334_v0 = vmax.f32 %v1272_v57, 0.0 }
 0x1d9   : > { %v1337_v63 = vmax.f32 %v1283_v59, 0.0 }
 0x1da   : > { %v1335_v1 = vmax.f32 %v1275_v61, 0.0 }
 0x1db   : > { %v1351_v2 = vpack.c.bf16 %v1337_v63, %v1336_v62 }
 0x1dc   : > { %v1350_v3 = vpack.c.bf16 %v1335_v1, %v1334_v0  ;;  %v1984_v4 = vpop.f32.mrb[28].mxu1 }
 0x1dd   : > { %v1296_v5 = vadd.f32 %v1984_v4, %v1775_v53  ;;  %v1287_v6 = vpop.f32.mrb[29].mxu1 }
 0x1de   : > { %v1288_v7 = vadd.f32 %v1775_v53, %v1287_v6  ;;  %v1985_v8 = vpop.f32.mrb[30].mxu1  ;;  %2010 = vmatprep.mubr.bf16.mxu0 %v1350_v3 }
 0x1df   : > { %v1299_v10 = vadd.f32 %v1985_v8, %v1775_v53  ;;  %v1290_v12 = vpop.f32.mrb[31].mxu1  ;;  %2011 = vmatmul.mubr.bf16.vlgmr.msra.gmra.mrb[24].mxu0 %v1351_v2  ;;  %v1340_v11 = vmax.f32 %v1296_v5, 0.0 }
 0x1e0   : > { %v1291_v13 = vadd.f32 %v1775_v53, %v1290_v12  ;;  %v1338_v16 = vmax.f32 %v1288_v7, 0.0 }
 0x1e1   : > { %v1341_v9 = vmax.f32 %v1299_v10, 0.0 }
 0x1e2   : > { %v1339_v18 = vmax.f32 %v1291_v13, 0.0 }
 0x1e3   : > { %v1353_v20 = vpack.c.bf16 %v1341_v9, %v1340_v11 }
 0x1e4   : > { %v1352_v28 = vpack.c.bf16 %v1339_v18, %v1338_v16  ;;  %v1988_v43 = vpop.f32.mrb[32].mxu1 }
 0x1e5   : > { %v1312_v30 = vadd.f32 %v1988_v43, %v1775_v53  ;;  %v1303_v17 = vpop.f32.mrb[33].mxu1 }
 0x1e6   : > { %v1304_v14 = vadd.f32 %v1775_v53, %v1303_v17  ;;  %v1989_v32 = vpop.f32.mrb[34].mxu1  ;;  %2014 = vmatprep.mubr.bf16.mxu0 %v1352_v28 }
 0x1e7   : > { %v1315_v21 = vadd.f32 %v1989_v32, %v1775_v53  ;;  %v1306_v34 = vpop.f32.mrb[35].mxu1  ;;  %2015 = vmatmul.mubr.bf16.gmra.mrb[28].mxu0 %v1353_v20  ;;  %v1344_v24 = vmax.f32 %v1312_v30, 0.0 }
 0x1e8   : > { %v1307_v23 = vadd.f32 %v1775_v53, %v1306_v34  ;;  %v1342_v36 = vmax.f32 %v1304_v14, 0.0 }
 0x1e9   : > { %v1345_v22 = vmax.f32 %v1315_v21, 0.0 }
 0x1ea   : > { %v1343_v19 = vmax.f32 %v1307_v23, 0.0 }
 0x1eb   : > { %v1355_v25 = vpack.c.bf16 %v1345_v22, %v1344_v24 }
 0x1ec   : > { %v1354_v26 = vpack.c.bf16 %v1343_v19, %v1342_v36  ;;  %v1992_v38 = vpop.f32.mrb[36].mxu1 }
 0x1ed   : > { %v1328_v27 = vadd.f32 %v1992_v38, %v1775_v53  ;;  %v1319_v15 = vpop.f32.mrb[37].mxu1 }
 0x1ee   : > { %v1320_v40 = vadd.f32 %v1775_v53, %v1319_v15  ;;  %v1993_v29 = vpop.f32.mrb[38].mxu1  ;;  %2018 = vmatprep.mubr.bf16.mxu0 %v1354_v26 }
 0x1ef   : > { %v1331_v31 = vadd.f32 %v1993_v29, %v1775_v53  ;;  %v1322_v33 = vpop.f32.mrb[39].mxu1  ;;  %2019 = vmatmul.mubr.bf16.gmra.mrb[32].mxu0 %v1355_v25  ;;  %v1348_v42 = vmax.f32 %v1328_v27, 0.0 }
 0x1f0   : > { %v1323_v35 = vadd.f32 %v1775_v53, %v1322_v33  ;;  %v1346_v44 = vmax.f32 %v1320_v40, 0.0 }
 0x1f1   : > { %v1349_v37 = vmax.f32 %v1331_v31, 0.0 }
 0x1f2   : > { %v1347_v39 = vmax.f32 %v1323_v35, 0.0 }
 0x1f3   : > { %v1357_v45 = vpack.c.bf16 %v1349_v37, %v1348_v42 }
 0x1f4   : > { %v1356_v46 = vpack.c.bf16 %v1347_v39, %v1346_v44 }
 0x1f6   : > { %2022 = vmatprep.mubr.bf16.mxu0 %v1356_v46 }
 0x1f7   : > { %2023 = vmatmul.mubr.bf16.gmra.mrb[36].mxu0 %v1357_v45 }
 0x2b2   : > { %v2012_v48 = vpop.f32.mrb[24].mxu0 }
 0x2b3   : > { %v1472_v49 = vadd.f32 %v2012_v48, %v2509_v47  ;;  %v1463_v41 = vpop.f32.mrb[25].mxu0 }
 0x2b4   : > { %v1464_v50 = vadd.f32 %v2509_v47, %v1463_v41  ;;  %v2013_v51 = vpop.f32.mrb[26].mxu0  ;;  %v434_v41 = vpop.xlane.xlu0 %433 }
 0x2b5   : > { %v1528_v53 = vmax.f32 %v1472_v49, 0.0  ;;  %v1475_v54 = vadd.f32 %v2013_v51, %v2509_v47  ;;  %v1466_v55 = vpop.f32.mrb[27].mxu0 }
 0x2b6   : > { %v1467_v56 = vadd.f32 %v2509_v47, %v1466_v55  ;;  %v1526_v57 = vmax.f32 %v1464_v50, 0.0  ;;  %v440_v50 = vpop.xlane.xlu1 %439 }
 0x2b7   : > { %v1529_v58 = vmax.f32 %v1475_v54, 0.0  ;;  %v1551_v59 = vmul.f32 %v2516_v52, %v1528_v53 }
 0x2b8   : > { %v1527_v60 = vmax.f32 %v1467_v56, 0.0  ;;  %v1549_v1 = vmul.f32 %v2516_v52, %v1526_v57  ;;  %v437_v51 = vpop.xlane.xlu0 %436 }
 0x2b9   : > { %1569 = vadd.xlane.f32.xlu0 %v1551_v59  ;;  %v1552_v61 = vmul.f32 %v2516_v52, %v1529_v58 }
 0x2ba   : > { %v2016_v62 = vpop.f32.mrb[28].mxu0  ;;  %v1550_v7 = vmul.f32 %v2516_v52, %v1527_v60 }
 0x2bb   : > { %v1488_v63 = vadd.f32 %v2016_v62, %v2509_v47  ;;  %1571 = vadd.xlane.f32.xlu1 %v1552_v61  ;;  %v1479_v0 = vpop.f32.mrb[29].mxu0 }
 0x2bc   : > { %v1480_v2 = vadd.f32 %v2509_v47, %v1479_v0  ;;  %v2017_v3 = vpop.f32.mrb[30].mxu0  ;;  %v2548_v53 = vpop.xlane.xlu0 %445 }
 0x2bd   : > { %v1532_v4 = vmax.f32 %v1488_v63, 0.0  ;;  %v1491_v5 = vadd.f32 %v2017_v3, %v2509_v47  ;;  %v1482_v6 = vpop.f32.mrb[31].mxu0  ;;  %1565 = vadd.xlane.f32.xlu0 %v1549_v1 }
 0x2be   : > { %v1483_v8 = vadd.f32 %v2509_v47, %v1482_v6  ;;  %v1530_v10 = vmax.f32 %v1480_v2, 0.0 }
 0x2bf   : > { %v1533_v12 = vmax.f32 %v1491_v5, 0.0  ;;  %1567 = vadd.xlane.f32.xlu1 %v1550_v7  ;;  %v1555_v13 = vmul.f32 %v2516_v52, %v1532_v4 }
 0x2c0   : > { %v1531_v11 = vmax.f32 %v1483_v8, 0.0  ;;  %v1553_v28 = vmul.f32 %v2516_v52, %v1530_v10  ;;  %v452_v55 = vpop.xlane.xlu0 %451 }
 0x2c1   : > { %1577 = vadd.xlane.f32.xlu0 %v1555_v13  ;;  %v1556_v9 = vmul.f32 %v2516_v52, %v1533_v12 }
 0x2c2   : > { %v2020_v16 = vpop.f32.mrb[32].mxu0  ;;  %v1554_v21 = vmul.f32 %v2516_v52, %v1531_v11 }
 0x2c3   : > { %v1504_v18 = vadd.f32 %v2020_v16, %v2509_v47  ;;  %v1495_v20 = vpop.f32.mrb[33].mxu0  ;;  %1579 = vadd.xlane.f32.xlu1 %v1556_v9 }
 0x2c4   : > { %v1496_v43 = vadd.f32 %v2509_v47, %v1495_v20  ;;  %v2021_v30 = vpop.f32.mrb[34].mxu0  ;;  %v2552_v57 = vpop.xlane.xlu0 %457 }
 0x2c5   : > { %v1536_v17 = vmax.f32 %v1504_v18, 0.0  ;;  %v1507_v14 = vadd.f32 %v2021_v30, %v2509_v47  ;;  %v1498_v32 = vpop.f32.mrb[35].mxu0  ;;  %1573 = vadd.xlane.f32.xlu0 %v1553_v28 }
 0x2c6   : > { %v1499_v34 = vadd.f32 %v2509_v47, %v1498_v32  ;;  %v1534_v23 = vmax.f32 %v1496_v43, 0.0 }
 0x2c7   : > { %v1537_v24 = vmax.f32 %v1507_v14, 0.0  ;;  %1575 = vadd.xlane.f32.xlu1 %v1554_v21  ;;  %v1559_v22 = vmul.f32 %v2516_v52, %v1536_v17  ;;  %v2576_v17 = vstv %s1629_s27 }
 0x2c8   : > { %v1535_v36 = vmax.f32 %v1499_v34, 0.0  ;;  %v1557_v38 = vmul.f32 %v2516_v52, %v1534_v23  ;;  %v2556_v59 = vpop.xlane.xlu0 %463 }
 0x2c9   : > { %1585 = vadd.xlane.f32.xlu0 %v1559_v22  ;;  %v1560_v19 = vmul.f32 %v2516_v52, %v1537_v24 }
 0x2ca   : > { %v2024_v25 = vpop.f32.mrb[36].mxu0  ;;  %v1558_v31 = vmul.f32 %v2516_v52, %v1535_v36 }
 0x2cb   : > { %v1511_v26 = vpop.f32.mrb[37].mxu0  ;;  %1587 = vadd.xlane.f32.xlu1 %v1560_v19  ;;  %v1520_v27 = vadd.f32 %v2024_v25, %v2509_v47 }
 0x2cc   : > { %v1512_v15 = vadd.f32 %v2509_v47, %v1511_v26  ;;  %v2025_v40 = vpop.f32.mrb[38].mxu0 }
 0x2cd   : > { %v1514_v29 = vpop.f32.mrb[39].mxu0  ;;  %1581 = vadd.xlane.f32.xlu0 %v1557_v38  ;;  %v1523_v35 = vadd.f32 %v2025_v40, %v2509_v47  ;;  %v1540_v37 = vmax.f32 %v1520_v27, 0.0 }
 0x2ce   : > { %v1538_v33 = vmax.f32 %v1512_v15, 0.0  ;;  %v1515_v42 = vadd.f32 %v2509_v47, %v1514_v29  ;;  %v443_v47 = vpop.xlane.xlu1 %442 }
 0x2cf   : > { %1583 = vadd.xlane.f32.xlu1 %v1558_v31  ;;  %v1541_v45 = vmax.f32 %v1523_v35, 0.0  ;;  %v1563_v48 = vmul.f32 %v2516_v52, %v1540_v37 }
 0x2d0   : > { %v1539_v44 = vmax.f32 %v1515_v42, 0.0  ;;  %v1561_v39 = vmul.f32 %v2516_v52, %v1538_v33 }
 0x2d1   : > { %v1564_v49 = vmul.f32 %v2516_v52, %v1541_v45 }
 0x2d2   : > { %1589 = vadd.xlane.f32.xlu0 %v1561_v39  ;;  %v1562_v46 = vmul.f32 %v2516_v52, %v1539_v44  ;;  %v2550_v54 = vpop.xlane.xlu1 %448  ;;  %v2560_v52 = vpop.xlane.xlu0 %469 }
 0x2d4   : > { %1591 = vadd.xlane.f32.xlu1 %v1562_v46 }
 0x2d6   : > { %1593 = vadd.xlane.f32.xlu0 %v1563_v48  ;;  %v455_v56 = vpop.xlane.xlu1 %454  ;;  %v2564_v62 = vpop.xlane.xlu0 %475 }
 0x2d8   : > { %1595 = vadd.xlane.f32.xlu1 %v1564_v49 }
 0x2da   : > { %v2554_v58 = vpop.xlane.xlu1 %460  ;;  %v925_v0 = vpop.xlane.xlu0 %924 }
 0x2db   : > { %v971_v43 = vmul.f32 0.5, %v925_v0 }
 0x2dd   : > { %v1597_v19 = vadd.f32 %v971_v43, %v434_v41 }
 0x2de   : > { %v2558_v60 = vpop.xlane.xlu1 %466  ;;  %v931_v2 = vpop.xlane.xlu0 %930 }
 0x2df   : > { %v973_v16 = vmul.f32 0.5, %v931_v2 }
 0x2e1   : > { %v1599_v30 = vadd.f32 %v973_v16, %v440_v50 }
 0x2e2   : > { %v2562_v61 = vpop.xlane.xlu1 %472  ;;  %v937_v4 = vpop.xlane.xlu0 %936 }
 0x2e3   : > { %v975_v29 = vmul.f32 0.5, %v937_v4 }
 0x2e5   : > { %v1601_v50 = vadd.f32 %v975_v29, %v2548_v53 }
 0x2e6   : > { %v2566_v63 = vpop.xlane.xlu1 %478  ;;  %v943_v6 = vpop.xlane.xlu0 %942 }
 0x2e7   : > { %v977_v24 = vmul.f32 0.5, %v943_v6 }
 0x2e9   : > { %v1603_v35 = vadd.f32 %v977_v24, %v452_v55 }
 0x2ea   : > { %v928_v1 = vpop.xlane.xlu1 %927  ;;  %v949_v8 = vpop.xlane.xlu0 %948 }
 0x2eb   : > { %v972_v32 = vmul.f32 0.5, %v928_v1  ;;  %v979_v2 = vmul.f32 0.5, %v949_v8 }
 0x2ed   : > { %v1598_v15 = vadd.f32 %v972_v32, %v437_v51 }
 0x2ee   : > { %v934_v3 = vpop.xlane.xlu1 %933  ;;  %v955_v12 = vpop.xlane.xlu0 %954 }
 0x2ef   : > { %v974_v20 = vmul.f32 0.5, %v934_v3  ;;  %v981_v48 = vmul.f32 0.5, %v955_v12 }
 0x2f1   : > { %v1600_v34 = vadd.f32 %v974_v20, %v443_v47  ;;  %v1607_v53 = vadd.f32 %v981_v48, %v2556_v59  ;;  %v1605_v20 = vadd.f32 %v979_v2, %v2552_v57 }
 0x2f2   : > { %v940_v5 = vpop.xlane.xlu1 %939  ;;  %v2568_v11 = vpop.xlane.xlu0 %960 }
 0x2f3   : > { %v976_v37 = vmul.f32 0.5, %v940_v5  ;;  %v983_v59 = vmul.f32 0.5, %v2568_v11 }
 0x2f6   : > { %v946_v7 = vpop.xlane.xlu1 %945  ;;  %v2572_v18 = vpop.xlane.xlu0 %966 }
 0x2f7   : > { %v978_v26 = vmul.f32 0.5, %v946_v7  ;;  %v985_v11 = vmul.f32 0.5, %v2572_v18 }
 0x2f9   : > { %v1604_v45 = vadd.f32 %v978_v26, %v455_v56  ;;  %v1602_v56 = vadd.f32 %v976_v37, %v2550_v54 }
 0x2fa   : > { %v952_v10 = vpop.xlane.xlu1 %951 }
 0x2fb   : > { %v980_v6 = vmul.f32 0.5, %v952_v10 }
 0x2fe   : > { %v958_v13 = vpop.xlane.xlu1 %957 }
 0x2ff   : > { %v982_v47 = vmul.f32 0.5, %v958_v13 }
 0x301   : > { %v1608_v54 = vadd.f32 %v982_v47, %v2558_v60  ;;  %v1606_v60 = vadd.f32 %v980_v6, %v2554_v58 }
 0x302   : > { %v2570_v9 = vpop.xlane.xlu1 %963 }
 0x306   : > { %v2574_v28 = vpop.xlane.xlu1 %969 }
 0x307   : > { %v986_v58 = vmul.f32 0.5, %v2574_v28 }
 0x309   : > { %v1612_v28 = vadd.f32 %v986_v58, %v2566_v63 }
 0x346   : > { %v1570_v14 = vpop.xlane.xlu0 %1569 }
 0x347   : > { %v1615_v21 = vadd.f32 %v1599_v30, %v1570_v14  ;;  %v984_v14 = vmul.f32 0.5, %v2570_v9 }
 0x348   : > { %v1572_v23 = vpop.xlane.xlu1 %1571 }
 0x349   : > { %v1633_v22 = vadd.f32 %v2576_v17, %v1615_v21  ;;  %v1616_v36 = vadd.f32 %v1600_v34, %v1572_v23  ;;  %v1609_v34 = vadd.f32 %v983_v59, %v2560_v52  ;;  %v1611_v52 = vadd.f32 %v985_v11, %v2564_v62 }
 0x34a   : > { %v1566_v25 = vpop.xlane.xlu0 %1565 }
 0x34b   : > { %1650 = vst.msk [vmem:[%s2583_s12 + $0x10] sm:$0xff] %vm1647_vm6, %v1633_v22  ;;  %v1634_v38 = vadd.f32 %v2576_v17, %v1616_v36  ;;  %v1613_v27 = vadd.f32 %v1597_v19, %v1566_v25  ;;  %v1610_v22 = vadd.f32 %v984_v14, %v2562_v61 }
 0x34c   : > { %v1568_v40 = vpop.xlane.xlu1 %1567 }
 0x34d   : > { %1651 = vst.msk [vmem:[%s2583_s12 + $0x18] sm:$0xff] %vm1647_vm6, %v1634_v38  ;;  %v1631_v31 = vadd.f32 %v2576_v17, %v1613_v27  ;;  %v1614_v33 = vadd.f32 %v1598_v15, %v1568_v40 }
 0x34e   : > { %v1578_v42 = vpop.xlane.xlu0 %1577 }
 0x34f   : > { %1648 = vst.msk [vmem:[%s2583_s12] sm:$0xff] %vm1647_vm6, %v1631_v31  ;;  %v1632_v44 = vadd.f32 %v2576_v17, %v1614_v33  ;;  %v1619_v39 = vadd.f32 %v1603_v35, %v1578_v42 }
 0x350   : > { %v1580_v46 = vpop.xlane.xlu1 %1579 }
 0x351   : > { %1649 = vst.msk [vmem:[%s2583_s12 + $0x8] sm:$0xff] %vm1647_vm6, %v1632_v44  ;;  %v1637_v49 = vadd.f32 %v2576_v17, %v1619_v39  ;;  %v1620_v41 = vadd.f32 %v1604_v45, %v1580_v46 }
 0x352   : > { %v1574_v51 = vpop.xlane.xlu0 %1573 }
 0x353   : > { %1654 = vst.msk [vmem:[%s2583_s12 + $0x30] sm:$0xff] %vm1647_vm6, %v1637_v49  ;;  %v1638_v55 = vadd.f32 %v2576_v17, %v1620_v41  ;;  %v1617_v0 = vadd.f32 %v1601_v50, %v1574_v51 }
 0x354   : > { %v1576_v1 = vpop.xlane.xlu1 %1575 }
 0x355   : > { %1655 = vst.msk [vmem:[%s2583_s12 + $0x38] sm:$0xff] %vm1647_vm6, %v1638_v55  ;;  %v1635_v3 = vadd.f32 %v2576_v17, %v1617_v0  ;;  %v1618_v4 = vadd.f32 %v1602_v56, %v1576_v1 }
 0x356   : > { %v1586_v5 = vpop.xlane.xlu0 %1585 }
 0x357   : > { %1652 = vst.msk [vmem:[%s2583_s12 + $0x20] sm:$0xff] %vm1647_vm6, %v1635_v3  ;;  %v1636_v7 = vadd.f32 %v2576_v17, %v1618_v4  ;;  %v1623_v12 = vadd.f32 %v1607_v53, %v1586_v5 }
 0x358   : > { %v1588_v13 = vpop.xlane.xlu1 %1587 }
 0x359   : > { %1653 = vst.msk [vmem:[%s2583_s12 + $0x28] sm:$0xff] %vm1647_vm6, %v1636_v7  ;;  %v1641_v8 = vadd.f32 %v2576_v17, %v1623_v12  ;;  %v1624_v16 = vadd.f32 %v1608_v54, %v1588_v13 }
 0x35a   : > { %v1582_v10 = vpop.xlane.xlu0 %1581 }
 0x35b   : > { %1658 = vst.msk [vmem:[%s2583_s12 + $0x50] sm:$0xff] %vm1647_vm6, %v1641_v8  ;;  %v1642_v43 = vadd.f32 %v2576_v17, %v1624_v16  ;;  %v1621_v30 = vadd.f32 %v1605_v20, %v1582_v10 }
 0x35c   : > { %v1584_v32 = vpop.xlane.xlu1 %1583 }
 0x35d   : > { %1659 = vst.msk [vmem:[%s2583_s12 + $0x58] sm:$0xff] %vm1647_vm6, %v1642_v43  ;;  %v1639_v21 = vadd.f32 %v2576_v17, %v1621_v30  ;;  %v1622_v57 = vadd.f32 %v1606_v60, %v1584_v32 }
 0x35f   : > { %1656 = vst.msk [vmem:[%s2583_s12 + $0x40] sm:$0xff] %vm1647_vm6, %v1639_v21  ;;  %v1640_v23 = vadd.f32 %v2576_v17, %v1622_v57  ;;  %v1590_v24 = vpop.xlane.xlu0 %1589 }
 0x360   : > { %v1625_v9 = vadd.f32 %v1609_v34, %v1590_v24 }
 0x361   : > { %1657 = vst.msk [vmem:[%s2583_s12 + $0x48] sm:$0xff] %vm1647_vm6, %v1640_v23  ;;  %v1592_v36 = vpop.xlane.xlu1 %1591 }
 0x362   : > { %v1643_v18 = vadd.f32 %v2576_v17, %v1625_v9  ;;  %v1626_v19 = vadd.f32 %v1610_v22, %v1592_v36 }
 0x363   : > { %v1594_v25 = vpop.xlane.xlu0 %1593 }
 0x364   : > { %1660 = vst.msk [vmem:[%s2583_s12 + $0x60] sm:$0xff] %vm1647_vm6, %v1643_v18  ;;  %v1644_v26 = vadd.f32 %v2576_v17, %v1626_v19  ;;  %v1627_v38 = vadd.f32 %v1611_v52, %v1594_v25 }
 0x365   : > { %v1596_v27 = vpop.xlane.xlu1 %1595 }
 0x366   : > { %1661 = vst.msk [vmem:[%s2583_s12 + $0x68] sm:$0xff] %vm1647_vm6, %v1644_v26  ;;  %v1645_v61 = vadd.f32 %v2576_v17, %v1627_v38  ;;  %v1628_v15 = vadd.f32 %v1612_v28, %v1596_v27 }
 0x368   : > { %1662 = vst.msk [vmem:[%s2583_s12 + $0x70] sm:$0xff] %vm1647_vm6, %v1645_v61  ;;  %v1646_v40 = vadd.f32 %v2576_v17, %v1628_v15 }
 0x36a   : > { %1663 = vst.msk [vmem:[%s2583_s12 + $0x78] sm:$0xff] %vm1647_vm6, %v1646_v40 }
 0x36b PF: > { %s22_s19 = sadd.s32 1, %s2084_s19  }
 0x36c   : > { %p19_p4 = scmp.ge.s32.totalorder %s22_s19, 5  }
 0x36e   :  { %21 = sbr.rel (!%p19_p4) target bundleno = 2 (0x2), region = 94 }

</bundles_post_ra>
